<compile_context>
chip_gen: v6e
topology: v6e:2x2x1
jax: 0.10.0
libtpu: 0.0.40
codegen_flags: <defaults>
</compile_context>

<pallas_src>
import functools
import math

import jax
import jax.numpy as jnp
from jax.experimental import pallas as pl
from jax.experimental.pallas import tpu as pltpu


def _dqn_kernel(x_ref, w1_ref, b1_ref, w2_ref, b2_ref, o_ref):
    # x_ref : (B, IN)       w1_ref: (IN, H)   b1_ref: (1, H)
    # w2_ref: (H, A)        b2_ref: (1, A)    o_ref : (B, A)
    # Weights arrive pre-transposed to (in, out), so this is a plain x @ w
    # chain: MXU matmul -> VPU bias+ReLU -> MXU matmul -> VPU bias.
    x = x_ref[...]
    h = jnp.dot(x, w1_ref[...], preferred_element_type=jnp.float32) + b1_ref[...]
    h = jnp.maximum(h, 0.0)
    q = jnp.dot(h, w2_ref[...], preferred_element_type=jnp.float32) + b2_ref[...]
    o_ref[...] = q.astype(o_ref.dtype)


def _cost_estimate(bs, in_dim, hidden, num_action):
    flops = 2 * bs * (in_dim * hidden + hidden * num_action)
    bytes_accessed = 4 * (
        bs * in_dim            # x
        + in_dim * hidden      # w1
        + hidden               # b1
        + hidden * num_action  # w2
        + num_action           # b2
        + bs * num_action      # out
    )
    return pl.CostEstimate(
        flops=flops, transcendentals=0, bytes_accessed=bytes_accessed)


@functools.partial(jax.jit, static_argnames=("batch_tile",))
def dqn_oracle_forward(x, w1, b1, w2, b2, *, batch_tile=None):
    """x: (B, *state_shape) float32. Returns (B, num_action) float32.

    batch_tile=None  -> single-block (no grid) fused kernel; best for small B
                        (act()-style dispatch-latency-bound calls).
    batch_tile=TB    -> tile only the batch axis (TB rows per step, TB % 8 == 0).
                        Recommended TB is 2048-8192 for large-batch scoring;
                        weights/biases stay VMEM-resident across steps and the
                        batch grid axis is "parallel" (both TCs on v7x when the
                        grid has >= 2 steps).  The partial last block is masked
                        by Pallas -- no wrapper-side padding/copy of x.
    """
    bs = x.shape[0]
    x_flat = x.reshape(bs, -1)                    # (B, 70) -- free metadata reshape
    in_dim = x_flat.shape[1]
    hidden = w1.shape[0]
    num_action = w2.shape[0]

    # One-time (tiny, <5 KB) re-layout of the grid-invariant operands:
    # weights to (in, out), biases to 2-D rows.
    w1_t = w1.T                                   # (in_dim, hidden)
    w2_t = w2.T                                   # (hidden, num_action)
    b1_2d = b1.reshape(1, hidden)
    b2_2d = b2.reshape(1, num_action)
    vmem = pltpu.MemorySpace.VMEM

    if batch_tile is None:
        # Tiny problem: no grid at all, every operand's block == full array in VMEM.
        return pl.pallas_call(
            _dqn_kernel,
            out_shape=jax.ShapeDtypeStruct((bs, num_action), jnp.float32),
            in_specs=[pl.BlockSpec(memory_space=vmem)] * 5,
            out_specs=pl.BlockSpec(memory_space=vmem),
            cost_estimate=_cost_estimate(bs, in_dim, hidden, num_action),
        )(x_flat, w1_t, b1_2d, w2_t, b2_2d)

    # --- batch-tiled path (large-batch eval / replay scoring) ---
    tb = int(batch_tile)
    assert tb % 8 == 0, "batch_tile must be a multiple of 8 (sublane constraint)"
    grid = (pl.cdiv(bs, tb),)                     # partial last block is masked by Pallas

    # Scoped-VMEM footprint: double-buffered x/out tiles + resident weights.
    # Only bump the limit when we'd approach v5e's 16 MiB scoped default; cap
    # at 64 MiB so the request stays valid on v7x's smaller physical VMEM.
    vmem_bytes = 4 * (2 * tb * in_dim + 2 * tb * num_action
                      + in_dim * hidden + hidden + hidden * num_action + num_action)
    cp_kwargs = dict(dimension_semantics=("parallel",))   # megacore on v7x
    if vmem_bytes > 12 * 1024 * 1024:
        cp_kwargs["vmem_limit_bytes"] = min(2 * vmem_bytes, 64 * 1024 * 1024)

    return pl.pallas_call(
        _dqn_kernel,
        out_shape=jax.ShapeDtypeStruct((bs, num_action), jnp.float32),
        grid=grid,
        in_specs=[
            pl.BlockSpec((tb, in_dim), lambda i: (i, 0)),          # x: tiled on batch
            pl.BlockSpec((in_dim, hidden), lambda i: (0, 0)),      # w1.T: resident
            pl.BlockSpec((1, hidden), lambda i: (0, 0)),           # b1: resident
            pl.BlockSpec((hidden, num_action), lambda i: (0, 0)),  # w2.T: resident
            pl.BlockSpec((1, num_action), lambda i: (0, 0)),       # b2: resident
        ],
        out_specs=pl.BlockSpec((tb, num_action), lambda i: (i, 0)),
        compiler_params=pltpu.CompilerParams(**cp_kwargs),
        cost_estimate=_cost_estimate(bs, in_dim, hidden, num_action),
    )(x_flat, w1_t, b1_2d, w2_t, b2_2d)


def init_params(key, state_shape=(7, 10), hidden=16, num_action=4):
    """Deterministic init mirroring nn.Linear shapes (uniform +/- 1/sqrt(fan_in))."""
    in_dim = math.prod(state_shape)
    k1, k2, k3, k4 = jax.random.split(key, 4)
    bound1 = 1.0 / math.sqrt(in_dim)
    bound2 = 1.0 / math.sqrt(hidden)
    w1 = jax.random.uniform(k1, (hidden, in_dim), jnp.float32, -bound1, bound1)
    b1 = jax.random.uniform(k2, (hidden,), jnp.float32, -bound1, bound1)
    w2 = jax.random.uniform(k3, (num_action, hidden), jnp.float32, -bound2, bound2)
    b2 = jax.random.uniform(k4, (num_action,), jnp.float32, -bound2, bound2)
    return w1, b1, w2, b2


def _reference(x, w1, b1, w2, b2):
    x_flat = x.reshape(x.shape[0], -1)
    return jnp.maximum(x_flat @ w1.T + b1, 0.0) @ w2.T + b2


if __name__ == "__main__":
    key = jax.random.PRNGKey(0)
    kx, kx2, kp = jax.random.split(key, 3)

    state_shape = (7, 10)
    w1, b1, w2, b2 = init_params(kp, state_shape=state_shape, hidden=16, num_action=4)

    # Small batch: fused, grid-less path (act()-style call).
    batch = 8
    x = jax.random.normal(kx, (batch,) + state_shape, jnp.float32)
    q = dqn_oracle_forward(x, w1, b1, w2, b2)
    jax.block_until_ready(q)
    ref = _reference(x, w1, b1, w2, b2)
    assert q.shape == (batch, 4)
    assert jnp.allclose(q, ref, atol=1e-5, rtol=1e-5)

    # Larger batch, non-multiple of the tile: exercises the batch-tiled path
    # (partial last block handled by Pallas, no wrapper pad, >=2 grid steps so
    # the "parallel" batch axis engages both TCs on v7x, VMEM-resident weights).
    batch2 = 5000
    tile2 = 2048
    x2 = jax.random.normal(kx2, (batch2,) + state_shape, jnp.float32)
    q2 = dqn_oracle_forward(x2, w1, b1, w2, b2, batch_tile=tile2)
    jax.block_until_ready(q2)
    ref2 = _reference(x2, w1, b1, w2, b2)
    assert q2.shape == (batch2, 4)
    assert jnp.allclose(q2, ref2, atol=1e-5, rtol=1e-5)

    print("KERNEL_OK")
</pallas_src>

<mosaic_0001>
module attributes {stable_mosaic.version = 11 : i64} {
  func.func @_dqn_kernel(%arg0: memref<8x70xf32, #tpu.memory_space<vmem>>, %arg1: memref<70x16xf32, #tpu.memory_space<vmem>>, %arg2: memref<1x16xf32, #tpu.memory_space<vmem>>, %arg3: memref<16x4xf32, #tpu.memory_space<vmem>>, %arg4: memref<1x4xf32, #tpu.memory_space<vmem>>, %arg5: memref<8x4xf32, #tpu.memory_space<vmem>>) attributes {dimension_semantics = [], scalar_prefetch = 0 : i64, scratch_operands = 0 : i64, tpu.core_type = #tpu.core_type<tc>} {
    %c0 = arith.constant 0 : index
    %c0_0 = arith.constant 0 : index
    %0 = vector.load %arg0[%c0, %c0_0] : memref<8x70xf32, #tpu.memory_space<vmem>>, vector<8x70xf32>
    %c0_1 = arith.constant 0 : index
    %c0_2 = arith.constant 0 : index
    %1 = vector.load %arg1[%c0_1, %c0_2] : memref<70x16xf32, #tpu.memory_space<vmem>>, vector<70x16xf32>
    %cst = arith.constant dense<0.000000e+00> : vector<8x16xf32>
    %2 = tpu.matmul %0, %1, %cst {dimension_numbers = #tpu.dot_dimension_numbers<[1], [0], [0], [1], [0, 0, 1, 1], [], []>} : vector<8x70xf32>, vector<70x16xf32>, vector<8x16xf32> -> vector<8x16xf32>
    %c0_3 = arith.constant 0 : index
    %c0_4 = arith.constant 0 : index
    %3 = vector.load %arg2[%c0_3, %c0_4] : memref<1x16xf32, #tpu.memory_space<vmem>>, vector<1x16xf32>
    %4 = vector.broadcast %3 : vector<1x16xf32> to vector<8x16xf32>
    %5 = arith.addf %2, %4 : vector<8x16xf32>
    %cst_5 = arith.constant 0.000000e+00 : f32
    %6 = vector.broadcast %cst_5 : f32 to vector<8x16xf32>
    %7 = arith.maximumf %5, %6 : vector<8x16xf32>
    %c0_6 = arith.constant 0 : index
    %c0_7 = arith.constant 0 : index
    %8 = vector.load %arg3[%c0_6, %c0_7] : memref<16x4xf32, #tpu.memory_space<vmem>>, vector<16x4xf32>
    %cst_8 = arith.constant dense<0.000000e+00> : vector<8x4xf32>
    %9 = tpu.matmul %7, %8, %cst_8 {dimension_numbers = #tpu.dot_dimension_numbers<[1], [0], [0], [1], [0, 0, 1, 1], [], []>} : vector<8x16xf32>, vector<16x4xf32>, vector<8x4xf32> -> vector<8x4xf32>
    %c0_9 = arith.constant 0 : index
    %c0_10 = arith.constant 0 : index
    %10 = vector.load %arg4[%c0_9, %c0_10] : memref<1x4xf32, #tpu.memory_space<vmem>>, vector<1x4xf32>
    %11 = vector.broadcast %10 : vector<1x4xf32> to vector<8x4xf32>
    %12 = arith.addf %9, %11 : vector<8x4xf32>
    %c0_11 = arith.constant 0 : index
    %c0_12 = arith.constant 0 : index
    %13 = vector.load %arg5[%c0_11, %c0_12] : memref<8x4xf32, #tpu.memory_space<vmem>>, vector<8x4xf32>
    tpu.vector_store %arg5[%c0_11, %c0_12], %12 {strides = array<i32>} : memref<8x4xf32, #tpu.memory_space<vmem>>, vector<8x4xf32>,
    return
  }
}

</mosaic_0001>

<bundles_post_ra>
// kernel: dqn_oracle_forward.1
= control target key start
LH: loop header
LB: loop body
LE: loop exit
PB: predicated region body
PF: predicated region fallthrough
CT: control target
= control target key end

     0   :  { %vm41_vm0 = vcmask 1045504   ;;  %v253_v0 = vmov 0.0   ;;  %vm254_vm1 = vmmov 0   ;;  %vm37_vm2 = vcmask 572416   ;;  %s330_s1 = inlined_call_operand.vmem [shape: f32[70,16], index: 1, kind: input, shape index: {}]   ;;  %s331_s0 = inlined_call_operand.vmem [shape: f32[8,70], index: 0, kind: input, shape index: {}]   ;;  %s332_s3 = inlined_call_operand.vmem [shape: f32[16,4], index: 3, kind: input, shape index: {}]   ;;  %s333_s2 = inlined_call_operand.vmem [shape: f32[1,16], index: 2, kind: input, shape index: {}]   ;;  %s334_s4 = inlined_call_operand.vmem [shape: f32[1,4], index: 4, kind: input, shape index: {}]   ;;  %s335_s5 = inlined_call_operand.vmem [shape: f32[8,4], index: 5, kind: output, shape index: {}]  }
   0x1   :  { %223 = vmatprep.subr.mxu0 %v253_v0  ;;  %v29_v1 = vld [vmem:[%s330_s1 + $0x40] sm:$0x3f]  ;;  %v28_v2 = vld [vmem:[%s330_s1 + $0x38] sm:$0xff]  ;;  %241 = vmatprep.mubr.msk.f32.mxu0 %vm254_vm1, %v253_v0  ;;  %v27_v3 = vld [vmem:[%s330_s1 + $0x30] sm:$0xff]  ;;  %vm125_vm3 = vcmask 130048   ;;  %vm199_vm4 = vcmask 31744  }
   0x2   :  { %224 = vmatpush3.msk.msra.mxu0 %vm41_vm0, %v29_v1  ;;  %244 = vmatprep.subr.mxu1 %v253_v0  ;;  %v26_v4 = vld [vmem:[%s330_s1 + $0x28] sm:$0xff]  ;;  %v25_v5 = vld [vmem:[%s330_s1 + $0x20] sm:$0xff]  ;;  %v24_v6 = vld [vmem:[%s330_s1 + $0x18] sm:$0xff] }
   0x3   :  { %225 = vmatprep.subr.mxu0 %v253_v0  ;;  %248 = vmatprep.mubr.msk.f32.mxu1 %vm254_vm1, %v253_v0  ;;  %v23_v7 = vld [vmem:[%s330_s1 + $0x10] sm:$0xff]  ;;  %v22_v8 = vld [vmem:[%s330_s1 + $0x8] sm:$0xff]  ;;  %v21_v9 = vld [vmem:[%s330_s1] sm:$0xff] }
   0x4   :  { %226 = vmatpush3.msra.mxu0 %v28_v2  ;;  %v20_v10 = vld [vmem:[%s331_s0] sm:$0xff]  ;;  %v117_v11 = vld [vmem:[%s332_s3 + $0x8] sm:$0xff] }
   0x5   :  { %227 = vmatprep.subr.mxu0 %v253_v0  ;;  %245 = vmatpush3.msra.mxu1 %v117_v11  ;;  %v116_v12 = vld [vmem:[%s332_s3] sm:$0xff] }
   0x6   :  { %228 = vmatpush3.msra.mxu0 %v27_v3  ;;  %246 = vmatprep.subr.mxu1 %v253_v0  ;;  %v205_v13 = vld [vmem:[%s333_s2] ss:$0 sm:$0xff] }
   0x7   :  { %229 = vmatprep.subr.mxu0 %v253_v0  ;;  %247 = vmatpush3.msra.mxu1 %v116_v12  ;;  %v208_v18 = vld [vmem:[%s334_s4] ss:$0 sm:$0xff] }
   0x8   :  { %230 = vmatpush3.msra.mxu0 %v26_v4 }
   0x9   :  { %231 = vmatprep.subr.mxu0 %v253_v0 }
   0xa   :  { %232 = vmatpush3.msra.mxu0 %v25_v5 }
   0xb   :  { %233 = vmatprep.subr.mxu0 %v253_v0 }
   0xc   :  { %234 = vmatpush3.msra.mxu0 %v24_v6 }
   0xd   :  { %235 = vmatprep.subr.mxu0 %v253_v0 }
   0xe   :  { %236 = vmatpush3.msra.mxu0 %v23_v7 }
   0xf   :  { %237 = vmatprep.subr.mxu0 %v253_v0 }
  0x10   :  { %238 = vmatpush3.msra.mxu0 %v22_v8 }
  0x11   :  { %239 = vmatprep.subr.mxu0 %v253_v0 }
  0x12   :  { %240 = vmatpush3.msra.mxu0 %v21_v9 }
  0x13   :  { %242 = vmatmul.mubr.msk.f32.vlgmr.msra.gmra.mxu0 %vm37_vm2, %v20_v10 }
  0xd3   :  { %v111_v14 = vpop.f32.mrf.mxu0 }
  0xd4   :  { %v112_v15 = vadd.f32 %v205_v13, %v111_v14 }
  0xd5   :  { %v243_v16 = vpop.f32.mrf.mxu0 }
  0xd6   :  { %v115_v17 = vmax.f32 %v112_v15, 0.0 }
  0xd8   :  { %249 = vmatmul.mubr.msk.f32.vlgmr.msra.gmra.mxu1 %vm125_vm3, %v115_v17 }
 0x198   :  { %v195_v19 = vpop.f32.mrf.mxu1 }
 0x199   :  { %v196_v20 = vadd.f32 %v208_v18, %v195_v19 }
 0x19a   :  { %v250_v21 = vpop.f32.mrf.mxu1 }
 0x19b   :  { %200 = vst.msk [vmem:[%s335_s5] sm:$0xff] %vm199_vm4, %v196_v20 }

</bundles_post_ra>
